<compile_context>
chip_gen: v5e
topology: v5e:2x2
jax: 0.10.0
libtpu: 0.0.40
codegen_flags: <defaults>
</compile_context>

<pallas_src>
import jax
import jax.numpy as jnp
from jax.experimental import pallas as pl
from jax.experimental.pallas import tpu as pltpu


def _round_up(x, m):
    return ((x + m - 1) // m) * m


def _proj_kernel(x_ref, w_ref, b_ref, o_ref, acc_ref):
    # x_ref: (tm, tk), w_ref: (tk, tn), b_ref: (1, tn), o_ref/acc_ref: (tm, tn)
    k = pl.program_id(2)

    @pl.when(k == 0)
    def _():
        acc_ref[...] = jnp.zeros_like(acc_ref)

    acc_ref[...] += jnp.dot(
        x_ref[...], w_ref[...], preferred_element_type=jnp.float32
    )

    @pl.when(k == pl.num_programs(2) - 1)
    def _():
        o_ref[...] = (acc_ref[...] + b_ref[...].astype(jnp.float32)).astype(
            o_ref.dtype
        )


def _select_tiles(M, D, V, x_bytes, w_bytes, o_bytes):
    """Pick (tm, tn, tk): MXU-filling, lane-dense, within a ~40 MiB VMEM
    working set so double buffering fits even v7x's 64 MiB physical VMEM."""
    # Row tile: 256 (fills v6e/v7x 256-row MXU, 2x128 passes on v5e); for tiny
    # decode batches just round M up to the 8-sublane granule.
    tm = 256 if M >= 256 else _round_up(M, 8)
    # Vocab tile: wide, lane-dense multiple of 128.
    tn = min(_round_up(V, 128), 1024)
    # K tile: full reduction dim when small (=> weight tile stays resident
    # across all inner M steps, streamed from HBM exactly once). Otherwise a
    # 128-aligned *divisor* of D so no padded garbage enters the accumulation.
    if D <= 2048:
        tk = D
    else:
        tk = D  # fallback: full K (correct, just VMEM-heavier)
        for cand in (2048, 1024, 512, 256, 128):
            if D % cand == 0:
                tk = cand
                break

    def working_set(tm_, tn_, tk_):
        return (
            2 * tm_ * tk_ * x_bytes      # double-buffered x blocks
            + 2 * tk_ * tn_ * w_bytes    # double-buffered weight blocks
            + 2 * tm_ * tn_ * o_bytes    # double-buffered output blocks
            + tm_ * tn_ * 4              # f32 accumulator scratch
            + 2 * tn_ * 4                # bias
        )

    budget = 40 * 1024 * 1024
    while working_set(tm, tn, tk) > budget and tk > 512 and tk % 256 == 0:
        tk //= 2
    while working_set(tm, tn, tk) > budget and tn > 128 and tn % 256 == 0:
        tn //= 2
    while working_set(tm, tn, tk) > budget and tm > 8 and tm % 16 == 0:
        tm //= 2
    return tm, tn, tk, working_set(tm, tn, tk)


@jax.jit
def proj_output_layer(x, weight_t, bias):
    """Computes x @ weight_t + bias with a Pallas TPU kernel.

    x:        (B, S, D)
    weight_t: (D, V)   -- transpose of PyTorch nn.Linear weight (V, D)
    bias:     (V,)
    returns:  (B, S, V)
    """
    B, S, D = x.shape
    V = weight_t.shape[1]
    M = B * S

    x2d = x.reshape(M, D)
    bias2d = bias.reshape(1, V)

    x_bytes = jnp.dtype(x.dtype).itemsize
    w_bytes = jnp.dtype(weight_t.dtype).itemsize
    o_bytes = x_bytes
    tm, tn, tk, ws = _select_tiles(M, D, V, x_bytes, w_bytes, o_bytes)

    # Vocab axis OUTER (many tiles -> good megacore sharding on v7x, weight
    # residency across the inner M axis), M middle, reduction K innermost.
    grid = (pl.cdiv(V, tn), pl.cdiv(M, tm), pl.cdiv(D, tk))

    cost = pl.CostEstimate(
        flops=2 * M * D * V,
        transcendentals=0,
        bytes_accessed=(
            M * D * x_bytes
            + D * V * w_bytes
            + V * jnp.dtype(bias.dtype).itemsize
            + M * V * o_bytes
        ),
    )

    vmem_limit = int(min(max(2 * ws, 32 * 1024 * 1024), 64 * 1024 * 1024))

    out2d = pl.pallas_call(
        _proj_kernel,
        out_shape=jax.ShapeDtypeStruct((M, V), x.dtype),
        grid_spec=pltpu.PrefetchScalarGridSpec(
            num_scalar_prefetch=0,
            grid=grid,
            in_specs=[
                pl.BlockSpec((tm, tk), lambda j, i, k: (i, k)),   # x rows
                pl.BlockSpec((tk, tn), lambda j, i, k: (k, j)),   # weight cols
                pl.BlockSpec((1, tn), lambda j, i, k: (0, j)),    # bias slice
            ],
            out_specs=pl.BlockSpec((tm, tn), lambda j, i, k: (i, j)),
            scratch_shapes=[pltpu.VMEM((tm, tn), jnp.float32)],
        ),
        compiler_params=pltpu.CompilerParams(
            dimension_semantics=("parallel", "parallel", "arbitrary"),
            vmem_limit_bytes=vmem_limit,
        ),
        cost_estimate=cost,
    )(x2d, weight_t, bias2d)

    return out2d.reshape(B, S, V)


if __name__ == "__main__":
    # Small shapes consistent with the module's forward: (B, S, D) -> (B, S, V)
    B, S, D, V = 2, 8, 32, 128

    key = jax.random.PRNGKey(0)
    kx, kw, kb = jax.random.split(key, 3)

    x = jax.random.normal(kx, (B, S, D), dtype=jnp.float32)
    # Deterministic "nn.Linear(dims, vocab_size)" parameters:
    # PyTorch weight shape is (V, D); we store its transpose (D, V).
    weight = jax.random.normal(kw, (V, D), dtype=jnp.float32) * (1.0 / jnp.sqrt(D))
    bias = jax.random.normal(kb, (V,), dtype=jnp.float32) * 0.01
    weight_t = weight.T  # (D, V)

    out = proj_output_layer(x, weight_t, bias)
    jax.block_until_ready(out)

    # Correctness check against plain JAX reference.
    ref = jnp.einsum("bsd,dv->bsv", x, weight_t) + bias
    assert out.shape == (B, S, V)
    assert jnp.allclose(out, ref, atol=1e-4, rtol=1e-4)

    print("KERNEL_OK")
</pallas_src>

<mosaic_0001>
module attributes {stable_mosaic.version = 11 : i64} {
  func.func @_proj_kernel(%arg0: i32, %arg1: i32, %arg2: i32, %arg3: memref<16x32xf32, #tpu.memory_space<vmem>>, %arg4: memref<32x128xf32, #tpu.memory_space<vmem>>, %arg5: memref<1x128xf32, #tpu.memory_space<vmem>>, %arg6: memref<16x128xf32, #tpu.memory_space<vmem>>, %arg7: memref<16x128xf32, #tpu.memory_space<vmem>>) attributes {dimension_semantics = [#tpu.dimension_semantics<parallel>, #tpu.dimension_semantics<parallel>, #tpu.dimension_semantics<arbitrary>], iteration_bounds = array<i64: 1, 1, 1>, scalar_prefetch = 0 : i64, scratch_operands = 1 : i64, tpu.core_type = #tpu.core_type<tc>, window_params = [{transform_indices = @transform_0, window_bounds = array<i64: 16, 32>}, {transform_indices = @transform_1, window_bounds = array<i64: 32, 128>}, {transform_indices = @transform_2, window_bounds = array<i64: 1, 128>}, {transform_indices = @transform_3, window_bounds = array<i64: 16, 128>}]} {
    %c0_i32 = arith.constant 0 : i32
    %0 = arith.cmpi eq, %arg2, %c0_i32 : i32
    %1 = arith.extui %0 : i1 to i32
    %c0_i32_0 = arith.constant 0 : i32
    %2 = arith.cmpi ne, %1, %c0_i32_0 : i32
    scf.if %2 {
      %cst_10 = arith.constant 0.000000e+00 : f32
      %12 = vector.broadcast %cst_10 : f32 to vector<16x128xf32>
      %c0_11 = arith.constant 0 : index
      %c0_12 = arith.constant 0 : index
      %13 = vector.load %arg7[%c0_11, %c0_12] : memref<16x128xf32, #tpu.memory_space<vmem>>, vector<16x128xf32>
      tpu.vector_store %arg7[%c0_11, %c0_12], %12 {strides = array<i32>} : memref<16x128xf32, #tpu.memory_space<vmem>>, vector<16x128xf32>,
    } else {
    }
    %c0 = arith.constant 0 : index
    %c0_1 = arith.constant 0 : index
    %3 = vector.load %arg7[%c0, %c0_1] : memref<16x128xf32, #tpu.memory_space<vmem>>, vector<16x128xf32>
    %c0_2 = arith.constant 0 : index
    %c0_3 = arith.constant 0 : index
    %4 = vector.load %arg3[%c0_2, %c0_3] : memref<16x32xf32, #tpu.memory_space<vmem>>, vector<16x32xf32>
    %c0_4 = arith.constant 0 : index
    %c0_5 = arith.constant 0 : index
    %5 = vector.load %arg4[%c0_4, %c0_5] : memref<32x128xf32, #tpu.memory_space<vmem>>, vector<32x128xf32>
    %cst = arith.constant dense<0.000000e+00> : vector<16x128xf32>
    %6 = tpu.matmul %4, %5, %cst {dimension_numbers = #tpu.dot_dimension_numbers<[1], [0], [0], [1], [0, 0, 1, 1], [], []>} : vector<16x32xf32>, vector<32x128xf32>, vector<16x128xf32> -> vector<16x128xf32>
    %7 = arith.addf %3, %6 : vector<16x128xf32>
    %c0_6 = arith.constant 0 : index
    %c0_7 = arith.constant 0 : index
    %8 = vector.load %arg7[%c0_6, %c0_7] : memref<16x128xf32, #tpu.memory_space<vmem>>, vector<16x128xf32>
    tpu.vector_store %arg7[%c0_6, %c0_7], %7 {strides = array<i32>} : memref<16x128xf32, #tpu.memory_space<vmem>>, vector<16x128xf32>,
    %c0_i32_8 = arith.constant 0 : i32
    %9 = arith.cmpi eq, %arg2, %c0_i32_8 : i32
    %10 = arith.extui %9 : i1 to i32
    %c0_i32_9 = arith.constant 0 : i32
    %11 = arith.cmpi ne, %10, %c0_i32_9 : i32
    scf.if %11 {
      %c0_10 = arith.constant 0 : index
      %c0_11 = arith.constant 0 : index
      %12 = vector.load %arg7[%c0_10, %c0_11] : memref<16x128xf32, #tpu.memory_space<vmem>>, vector<16x128xf32>
      %c0_12 = arith.constant 0 : index
      %c0_13 = arith.constant 0 : index
      %13 = vector.load %arg5[%c0_12, %c0_13] : memref<1x128xf32, #tpu.memory_space<vmem>>, vector<1x128xf32>
      %14 = vector.broadcast %13 : vector<1x128xf32> to vector<16x128xf32>
      %15 = arith.addf %12, %14 : vector<16x128xf32>
      %c0_14 = arith.constant 0 : index
      %c0_15 = arith.constant 0 : index
      %16 = vector.load %arg6[%c0_14, %c0_15] : memref<16x128xf32, #tpu.memory_space<vmem>>, vector<16x128xf32>
      tpu.vector_store %arg6[%c0_14, %c0_15], %15 {strides = array<i32>} : memref<16x128xf32, #tpu.memory_space<vmem>>, vector<16x128xf32>,
    } else {
    }
    return
  }
  func.func @transform_0(%arg0: i32, %arg1: i32, %arg2: i32) -> (i32, i32) {
    %c0_i32 = arith.constant 0 : i32
    return %arg1, %arg2 : i32, i32
  }
  func.func @transform_1(%arg0: i32, %arg1: i32, %arg2: i32) -> (i32, i32) {
    %c0_i32 = arith.constant 0 : i32
    return %arg2, %arg0 : i32, i32
  }
  func.func @transform_2(%arg0: i32, %arg1: i32, %arg2: i32) -> (i32, i32) {
    %c0_i32 = arith.constant 0 : i32
    %c0_i32_0 = arith.constant 0 : i32
    return %c0_i32, %arg0 : i32, i32
  }
  func.func @transform_3(%arg0: i32, %arg1: i32, %arg2: i32) -> (i32, i32) {
    %c0_i32 = arith.constant 0 : i32
    return %arg1, %arg0 : i32, i32
  }
}

</mosaic_0001>

<bundles_post_ra>
// kernel: proj_output_layer.1
= control target key start
LH: loop header
LB: loop body
LE: loop exit
PB: predicated region body
PF: predicated region fallthrough
CT: control target
= control target key end

     0   :  { %8 = vsyncpa [#allocation4], 0  ;;  %s264_s0 = inlined_call_operand.hbm [shape: f32[16,32], index: 0, kind: input, shape index: {}]   ;;  %s265_s1 = inlined_call_operand.hbm [shape: f32[32,128], index: 1, kind: input, shape index: {}]   ;;  %s266_s2 = inlined_call_operand.vmem [shape: f32[1,128], index: 2, kind: input, shape index: {}]   ;;  %s267_s3 = inlined_call_operand.hbm [shape: f32[16,128], index: 3, kind: output, shape index: {}]  }
   0x1   :  { %9 = vsyncpa [#allocation7], 0 }
   0x2   :  { %10 = vsyncpa [#allocation5], 0  ;;  %s15_s14 = sshll.u32 %s264_s0, 4  ;;  %s218_s15 = smov [#allocation3]   ;;  %s16_s14 = int_to_ptr.hbm [resolvable:$true] %s15_s14 }
   0x3   :  { %s17_s16 = sshll.u32 %s218_s15, 4  ;;  %s28_s19 = sshll.u32 %s265_s1, 4  ;;  %s18_s16 = int_to_ptr.vmem [resolvable:$true] %s17_s16  ;;  %s29_s19 = int_to_ptr.hbm [resolvable:$true] %s28_s19 }
   0x4   :  { %s219_s20 = smov 128   ;;  %s220_s21 = smov 8  }
   0x5   :  { %23 = dma.hbm_to_vmem [thread:$0]  %s16_s14, 256, %s18_s16, [#allocation4], %s219_s20, %s219_s20, %s220_s21  }
   0x6   :  { %s221_s22 = smov [#allocation6]  }
   0x7   :  { %s30_s23 = sshll.u32 %s221_s22, 4  ;;  %s31_s23 = int_to_ptr.vmem [resolvable:$true] %s30_s23 }
   0x8   :  { %36 = dma.hbm_to_vmem [thread:$0]  %s29_s19, 512, %s31_s23, [#allocation7], %s219_s20, %s219_s20, %s220_s21  }
   0x9   :  { %212 = dma.done.wait [#allocation4], 256  }
   0xa   :  { %213 = vsyncadd [#allocation4], 4294967040 }
   0xb   :  { %214 = dma.done.wait [#allocation7], 512  }
   0xc   :  { %215 = vsyncadd [#allocation7], 4294966784  ;;  %v60_v0 = vld [vmem:[#allocation6 + $0x18] sm:$0xff]  ;;  %v59_v1 = vld [vmem:[#allocation6 + $0x10] sm:$0xff]  ;;  %vm61_vm0 = vcmask 261120   ;;  %s222_s24 = smov [#allocation8]  }
   0xd   :  { %80 = vmatpush.msra.mxu0 %v60_v0  ;;  %130 = vmatpush.msra.mxu1 %v60_v0  ;;  %v58_v2 = vld [vmem:[#allocation6 + $0x8] sm:$0xff]  ;;  %v57_v3 = vld [vmem:[#allocation6] sm:$0xff]  ;;  %v55_v4 = vld [vmem:[#allocation3] sm:$0xff]  ;;  %s112_s25 = sshll.u32 %s222_s24, 4  ;;  %s114_s28 = sshll.u32 %s267_s3, 4  ;;  %s113_s25 = int_to_ptr.vmem [resolvable:$true] %s112_s25  ;;  %s115_s28 = int_to_ptr.hbm [resolvable:$true] %s114_s28 }
   0xe   :  { %v56_v5 = vld [vmem:[#allocation3 + $0x8] sm:$0xff]  ;;  %v139_v6 = vld [vmem:[%s266_s2] ss:$0 sm:$0xff] }
   0xf   :  { %81 = vmatpush.msra.mxu0 %v59_v1  ;;  %131 = vmatpush.msra.mxu1 %v59_v1 }
  0x11   :  { %82 = vmatpush.msra.mxu0 %v58_v2  ;;  %132 = vmatpush.msra.mxu1 %v58_v2 }
  0x13   :  { %83 = vmatpush.msra.mxu0 %v57_v3  ;;  %133 = vmatpush.msra.mxu1 %v57_v3 }
  0x14   :  { %128 = vmatmul.msk.f32.vlgmr.msra.gmra.mxu0 %vm61_vm0, %v55_v4  ;;  %129 = vmatmul.msk.f32.vlgmr.msra.gmra.mxu1 %vm61_vm0, %v56_v5 }
  0x91   :  { %v85_v7 = vpop.f32.mrf.mxu0  ;;  %v88_v8 = vpop.f32.mrf.mxu1 }
  0x92   :  { %v104_v9 = vadd.f32 %v139_v6, %v85_v7  ;;  %v105_v10 = vadd.f32 %v139_v6, %v88_v8 }
  0x94   :  { %106 = vst [vmem:[#allocation8] sm:$0xff] %v104_v9 }
  0x95   :  { %107 = vst [vmem:[#allocation8 + $0x8] sm:$0xff] %v105_v10 }
  0x96   :  { %120 = dma.vmem_to_hbm [thread:$0]  %s113_s25, 256, %s115_s28, [#allocation5], %s219_s20, %s219_s20, %s220_s21  }
  0x97   :  { %216 = dma.done.wait [#allocation5], 256  }
  0x98   :  { %217 = vsyncadd [#allocation5], 4294967040 }
  0x99   :  { %125 = vsyncpa [#allocation4], 1 }
  0x9a   :  { %126 = vsyncpa [#allocation7], 1 }
  0x9b   :  { %127 = vsyncpa [#allocation5], 1 }

</bundles_post_ra>
